<compile_context>
chip_gen: v7x
topology: tpu7x:2x2x1
jax: 0.10.0
libtpu: 0.0.40
codegen_flags: <defaults>
</compile_context>

<pallas_src>
import jax
import jax.numpy as jnp
from jax.experimental import pallas as pl
from jax.experimental.pallas import tpu as pltpu

BN_EPS = 1e-5


def _round_up(a, b):
    return (a + b - 1) // b * b


def chem_kernel(x_ref, w1_ref, b1_ref, w2_ref, b2_ref, w3_ref, b3_ref, o_ref):
    # Linear(in_f, n) + ReLU: bf16 MXU matmul, f32 accumulate, f32 epilogue.
    h = jnp.dot(x_ref[...], w1_ref[...], preferred_element_type=jnp.float32)
    h = jnp.maximum(h + b1_ref[...], 0.0)

    # Dropout(p=0.3): identity in eval mode.
    # TODO(synk): training-mode stochastic dropout (p=0.3) not implemented.

    # Linear(n, k) + ReLU.
    h = jnp.dot(h.astype(jnp.bfloat16), w2_ref[...],
                preferred_element_type=jnp.float32)
    h = jnp.maximum(h + b2_ref[...], 0.0)

    # BatchNorm1d(k) (running stats) is folded into w3/b3 by the wrapper.
    # Linear(k, 1): VPU broadcast-multiply + XLU lane reduce instead of a 1-wide MXU matmul.
    logits = jnp.sum(h * w3_ref[...], axis=-1, keepdims=True) + b3_ref[...]   # (tb, 1)

    # Lane-dense (1, tb) store; Sigmoid via EUP exp + approximate reciprocal.
    z = jnp.transpose(logits)                                                 # (1, tb)
    o_ref[...] = pl.reciprocal(1.0 + jnp.exp(-z), approx=True).astype(o_ref.dtype)


def chem_forward(x, params, *, tb=512):
    """x: (B, in_f) float. params: dict of f32 weights. Returns (B, 1) f32 probabilities."""
    B, in_f = x.shape
    n = params["w1"].shape[1]
    k = params["w2"].shape[1]

    # Batch tile: large enough to feed the MXU. If multiple tiles are needed, keep tb a
    # multiple of 128 so the lane-dense output block stays aligned; otherwise one full tile.
    if B <= tb:
        tb = _round_up(max(B, 8), 8)
    else:
        tb = _round_up(tb, 128)
    B_pad = _round_up(B, tb)
    num_tiles = B_pad // tb

    # bf16 matmul inputs (f32 accumulation in-kernel), f32 biases / epilogue (v5e-safe).
    x_bf = x.astype(jnp.bfloat16)
    if B_pad != B:
        x_bf = jnp.pad(x_bf, ((0, B_pad - B), (0, 0)))
    w1 = params["w1"].astype(jnp.bfloat16)
    w2 = params["w2"].astype(jnp.bfloat16)
    b1 = params["b1"].astype(jnp.float32)
    b2 = params["b2"].astype(jnp.float32)

    # Fold eval-mode BatchNorm1d into the last Linear:  BN(h) @ w3 + b3 == h @ w3' + b3'
    #   s   = gamma / sqrt(var + eps)
    #   w3' = w3 * s ,  b3' = (beta - mean * s) @ w3 + b3
    s = params["gamma"] * jax.lax.rsqrt(params["var"] + BN_EPS)                 # (1, k)
    w3_row = (params["w3"].reshape(1, k) * s).astype(jnp.float32)               # (1, k)
    b3_f = ((params["beta"] - params["mean"] * s) @ params["w3"]
            + params["b3"]).astype(jnp.float32)                                 # (1, 1)

    full = lambda shape: pl.BlockSpec(shape, lambda i: (0, 0))

    out = pl.pallas_call(
        chem_kernel,
        out_shape=jax.ShapeDtypeStruct((1, B_pad), jnp.float32),
        grid_spec=pltpu.PrefetchScalarGridSpec(
            num_scalar_prefetch=0,
            grid=(num_tiles,),
            in_specs=[
                pl.BlockSpec((tb, in_f), lambda i: (i, 0)),   # x tile (bf16)
                full((in_f, n)),                              # w1 (bf16)
                full((1, n)),                                 # b1
                full((n, k)),                                 # w2 (bf16)
                full((1, k)),                                 # b2
                full((1, k)),                                 # BN-folded w3 row
                full((1, 1)),                                 # BN-folded b3
            ],
            out_specs=pl.BlockSpec((1, tb), lambda i: (0, i)),
        ),
        compiler_params=pltpu.CompilerParams(
            dimension_semantics=("parallel",),
            vmem_limit_bytes=32 * 1024 * 1024),
    )(x_bf, w1, b1, w2, b2, w3_row, b3_f)

    return out[0, :B].reshape(B, 1)


def make_params(key, in_f, n, k):
    ks = jax.random.split(key, 10)
    scale = 0.05
    return {
        "w1": scale * jax.random.normal(ks[0], (in_f, n), jnp.float32),
        "b1": scale * jax.random.normal(ks[1], (1, n), jnp.float32),
        "w2": scale * jax.random.normal(ks[2], (n, k), jnp.float32),
        "b2": scale * jax.random.normal(ks[3], (1, k), jnp.float32),
        "gamma": 1.0 + 0.1 * jax.random.normal(ks[4], (1, k), jnp.float32),
        "beta": 0.1 * jax.random.normal(ks[5], (1, k), jnp.float32),
        "mean": 0.1 * jax.random.normal(ks[6], (1, k), jnp.float32),
        "var": jnp.abs(jax.random.normal(ks[7], (1, k), jnp.float32)) + 0.5,
        "w3": scale * jax.random.normal(ks[8], (k, 1), jnp.float32),
        "b3": 0.1 * jax.random.normal(ks[9], (1, 1), jnp.float32),
    }


def chem_forward_ref(x, p):
    h = jnp.maximum(x @ p["w1"] + p["b1"], 0.0)
    h = jnp.maximum(h @ p["w2"] + p["b2"], 0.0)
    h = (h - p["mean"]) * jax.lax.rsqrt(p["var"] + BN_EPS) * p["gamma"] + p["beta"]
    return jax.nn.sigmoid(h @ p["w3"] + p["b3"])


if __name__ == "__main__":
    in_f, n, k = 32, 128, 128   # small, TPU-friendly shapes
    key = jax.random.PRNGKey(0)
    kx1, kx2, kp = jax.random.split(key, 3)
    params = make_params(kp, in_f, n, k)

    # Small single-tile case.
    x1 = jax.random.normal(kx1, (16, in_f), jnp.float32)
    y1 = jax.block_until_ready(chem_forward(x1, params))
    assert y1.shape == (16, 1)
    # Tolerance covers bf16 matmul inputs + approximate reciprocal in the sigmoid.
    assert jnp.allclose(y1, chem_forward_ref(x1, params), atol=5e-3)

    # Multi-tile + batch-padding case (exercises lane-dense output blocks and grid > 1).
    x2 = jax.random.normal(kx2, (200, in_f), jnp.float32)
    y2 = jax.block_until_ready(chem_forward(x2, params, tb=128))
    assert y2.shape == (200, 1)
    assert jnp.allclose(y2, chem_forward_ref(x2, params), atol=5e-3)

    print("KERNEL_OK")
</pallas_src>

<mosaic_0001>
module attributes {stable_mosaic.version = 11 : i64} {
  func.func @chem_kernel(%arg0: i32, %arg1: memref<16x32xbf16, #tpu.memory_space<vmem>>, %arg2: memref<32x128xbf16, #tpu.memory_space<vmem>>, %arg3: memref<1x128xf32, #tpu.memory_space<vmem>>, %arg4: memref<128x128xbf16, #tpu.memory_space<vmem>>, %arg5: memref<1x128xf32, #tpu.memory_space<vmem>>, %arg6: memref<1x128xf32, #tpu.memory_space<vmem>>, %arg7: memref<1x1xf32, #tpu.memory_space<vmem>>, %arg8: memref<1x16xf32, #tpu.memory_space<vmem>>) attributes {dimension_semantics = [#tpu.dimension_semantics<parallel>], iteration_bounds = array<i64: 1>, scalar_prefetch = 0 : i64, scratch_operands = 0 : i64, tpu.core_type = #tpu.core_type<tc>, window_params = [{transform_indices = @transform_0, window_bounds = array<i64: 16, 32>}, {pipeline_mode = #tpu.pipeline_mode<synchronous>, transform_indices = @transform_1, window_bounds = array<i64: 32, 128>}, {pipeline_mode = #tpu.pipeline_mode<synchronous>, transform_indices = @transform_2, window_bounds = array<i64: 1, 128>}, {pipeline_mode = #tpu.pipeline_mode<synchronous>, transform_indices = @transform_3, window_bounds = array<i64: 128, 128>}, {pipeline_mode = #tpu.pipeline_mode<synchronous>, transform_indices = @transform_4, window_bounds = array<i64: 1, 128>}, {pipeline_mode = #tpu.pipeline_mode<synchronous>, transform_indices = @transform_5, window_bounds = array<i64: 1, 128>}, {pipeline_mode = #tpu.pipeline_mode<synchronous>, transform_indices = @transform_6, window_bounds = array<i64: 1, 1>}, {transform_indices = @transform_7, window_bounds = array<i64: 1, 16>}]} {
    %c0 = arith.constant 0 : index
    %c0_0 = arith.constant 0 : index
    %0 = vector.load %arg1[%c0, %c0_0] : memref<16x32xbf16, #tpu.memory_space<vmem>>, vector<16x32xbf16>
    %c0_1 = arith.constant 0 : index
    %c0_2 = arith.constant 0 : index
    %1 = vector.load %arg2[%c0_1, %c0_2] : memref<32x128xbf16, #tpu.memory_space<vmem>>, vector<32x128xbf16>
    %cst = arith.constant dense<0.000000e+00> : vector<16x128xf32>
    %2 = tpu.matmul %0, %1, %cst {dimension_numbers = #tpu.dot_dimension_numbers<[1], [0], [0], [1], [0, 0, 1, 1], [], []>} : vector<16x32xbf16>, vector<32x128xbf16>, vector<16x128xf32> -> vector<16x128xf32>
    %c0_3 = arith.constant 0 : index
    %c0_4 = arith.constant 0 : index
    %3 = vector.load %arg3[%c0_3, %c0_4] : memref<1x128xf32, #tpu.memory_space<vmem>>, vector<1x128xf32>
    %4 = vector.broadcast %3 : vector<1x128xf32> to vector<16x128xf32>
    %5 = arith.addf %2, %4 : vector<16x128xf32>
    %cst_5 = arith.constant 0.000000e+00 : f32
    %6 = vector.broadcast %cst_5 : f32 to vector<16x128xf32>
    %7 = arith.maximumf %5, %6 : vector<16x128xf32>
    %8 = arith.truncf %7 : vector<16x128xf32> to vector<16x128xbf16>
    %c0_6 = arith.constant 0 : index
    %c0_7 = arith.constant 0 : index
    %9 = vector.load %arg4[%c0_6, %c0_7] : memref<128x128xbf16, #tpu.memory_space<vmem>>, vector<128x128xbf16>
    %cst_8 = arith.constant dense<0.000000e+00> : vector<16x128xf32>
    %10 = tpu.matmul %8, %9, %cst_8 {dimension_numbers = #tpu.dot_dimension_numbers<[1], [0], [0], [1], [0, 0, 1, 1], [], []>} : vector<16x128xbf16>, vector<128x128xbf16>, vector<16x128xf32> -> vector<16x128xf32>
    %c0_9 = arith.constant 0 : index
    %c0_10 = arith.constant 0 : index
    %11 = vector.load %arg5[%c0_9, %c0_10] : memref<1x128xf32, #tpu.memory_space<vmem>>, vector<1x128xf32>
    %12 = vector.broadcast %11 : vector<1x128xf32> to vector<16x128xf32>
    %13 = arith.addf %10, %12 : vector<16x128xf32>
    %cst_11 = arith.constant 0.000000e+00 : f32
    %14 = vector.broadcast %cst_11 : f32 to vector<16x128xf32>
    %15 = arith.maximumf %13, %14 : vector<16x128xf32>
    %c0_12 = arith.constant 0 : index
    %c0_13 = arith.constant 0 : index
    %16 = vector.load %arg6[%c0_12, %c0_13] : memref<1x128xf32, #tpu.memory_space<vmem>>, vector<1x128xf32>
    %17 = vector.broadcast %16 : vector<1x128xf32> to vector<16x128xf32>
    %18 = arith.mulf %15, %17 : vector<16x128xf32>
    %cst_14 = arith.constant dense<0.000000e+00> : vector<16xf32>
    %19 = vector.multi_reduction <add>, %18, %cst_14 [1] : vector<16x128xf32> to vector<16xf32>
    %20 = vector.shape_cast %19 : vector<16xf32> to vector<16x1xf32>
    %c0_15 = arith.constant 0 : index
    %c0_16 = arith.constant 0 : index
    %21 = vector.load %arg7[%c0_15, %c0_16] : memref<1x1xf32, #tpu.memory_space<vmem>>, vector<1x1xf32>
    %22 = vector.broadcast %21 : vector<1x1xf32> to vector<16x1xf32>
    %23 = arith.addf %20, %22 : vector<16x1xf32>
    %24 = tpu.transpose %23, [1, 0] : vector<16x1xf32> -> vector<1x16xf32>
    %cst_17 = arith.constant 0.000000e+00 : f32
    %25 = vector.broadcast %cst_17 : f32 to vector<1x16xf32>
    %26 = arith.subf %25, %24 : vector<1x16xf32>
    %27 = math.exp %26 : vector<1x16xf32>
    %cst_18 = arith.constant 1.000000e+00 : f32
    %28 = vector.broadcast %cst_18 : f32 to vector<1x16xf32>
    %29 = arith.addf %28, %27 : vector<1x16xf32>
    %30 = tpu.reciprocal %29 {approx = true} : vector<1x16xf32> -> vector<1x16xf32>
    %c0_19 = arith.constant 0 : index
    %c0_20 = arith.constant 0 : index
    %31 = vector.load %arg8[%c0_19, %c0_20] : memref<1x16xf32, #tpu.memory_space<vmem>>, vector<1x16xf32>
    tpu.vector_store %arg8[%c0_19, %c0_20], %30 {strides = array<i32>} : memref<1x16xf32, #tpu.memory_space<vmem>>, vector<1x16xf32>,
    return
  }
  func.func @transform_0(%arg0: i32) -> (i32, i32) {
    %c0_i32 = arith.constant 0 : i32
    %c0_i32_0 = arith.constant 0 : i32
    return %arg0, %c0_i32 : i32, i32
  }
  func.func @transform_1(%arg0: i32) -> (i32, i32) {
    %c0_i32 = arith.constant 0 : i32
    %c0_i32_0 = arith.constant 0 : i32
    %c0_i32_1 = arith.constant 0 : i32
    return %c0_i32, %c0_i32_0 : i32, i32
  }
  func.func @transform_2(%arg0: i32) -> (i32, i32) {
    %c0_i32 = arith.constant 0 : i32
    %c0_i32_0 = arith.constant 0 : i32
    %c0_i32_1 = arith.constant 0 : i32
    return %c0_i32, %c0_i32_0 : i32, i32
  }
  func.func @transform_3(%arg0: i32) -> (i32, i32) {
    %c0_i32 = arith.constant 0 : i32
    %c0_i32_0 = arith.constant 0 : i32
    %c0_i32_1 = arith.constant 0 : i32
    return %c0_i32, %c0_i32_0 : i32, i32
  }
  func.func @transform_4(%arg0: i32) -> (i32, i32) {
    %c0_i32 = arith.constant 0 : i32
    %c0_i32_0 = arith.constant 0 : i32
    %c0_i32_1 = arith.constant 0 : i32
    return %c0_i32, %c0_i32_0 : i32, i32
  }
  func.func @transform_5(%arg0: i32) -> (i32, i32) {
    %c0_i32 = arith.constant 0 : i32
    %c0_i32_0 = arith.constant 0 : i32
    %c0_i32_1 = arith.constant 0 : i32
    return %c0_i32, %c0_i32_0 : i32, i32
  }
  func.func @transform_6(%arg0: i32) -> (i32, i32) {
    %c0_i32 = arith.constant 0 : i32
    %c0_i32_0 = arith.constant 0 : i32
    %c0_i32_1 = arith.constant 0 : i32
    return %c0_i32, %c0_i32_0 : i32, i32
  }
  func.func @transform_7(%arg0: i32) -> (i32, i32) {
    %c0_i32 = arith.constant 0 : i32
    %c0_i32_0 = arith.constant 0 : i32
    return %c0_i32, %arg0 : i32, i32
  }
}

</mosaic_0001>

<bundles_post_ra>
// kernel: tpu_custom_call.1
= control target key start
LH: loop header
LB: loop body
LE: loop exit
PB: predicated region body
PF: predicated region fallthrough
CT: control target
= control target key end

     0   :  { %s637_s0 = inlined_call_operand.hbm [shape: bf16[16,32], index: 0, kind: input, shape index: {}]   ;;  %s638_s1 = inlined_call_operand.hbm [shape: bf16[32,128], index: 1, kind: input, shape index: {}]   ;;  %s639_s2 = inlined_call_operand.vmem [shape: f32[1,128], index: 2, kind: input, shape index: {}]   ;;  %s640_s3 = inlined_call_operand.hbm [shape: bf16[128,128], index: 3, kind: input, shape index: {}]   ;;  %s641_s4 = inlined_call_operand.vmem [shape: f32[1,128], index: 4, kind: input, shape index: {}]   ;;  %s642_s5 = inlined_call_operand.vmem [shape: f32[1,128], index: 5, kind: input, shape index: {}]   ;;  %s643_s6 = inlined_call_operand.<no memory space> [shape: f32[1,1], index: 6, kind: input, shape index: {}]   ;;  %s644_s7 = inlined_call_operand.hbm [shape: f32[1,16], index: 7, kind: output, shape index: {}]  }
   0x1   :  { %v12_v0 = vstv %s643_s6 }
   0x2   :  { %13 = vst [vmem:[#allocation2] sm:$0x1] %v12_v0 }
   0x3   :  { %14 = vsyncpa [#allocation4], 0 }
   0x4   :  { %15 = vsyncpa [#allocation7], 0 }
   0x5   :  { %16 = vsyncpa [#allocation5], 0  ;;  %s513_s26 = smov [#allocation6]   ;;  %s514_s28 = smov [#allocation3]  }
   0x6   :  { %s34_s27 = sshll.u32 %s513_s26, 4  ;;  %s22_s29 = sshll.u32 %s514_s28, 4  ;;  %s35_s27 = int_to_ptr.vmem [resolvable:$true] %s34_s27  ;;  %s564_s29 = int_to_ptr.vmem [resolvable:$true] %s22_s29 }
   0x7   :  { %s419_s9 = scalar_lea.hbm %s638_s1, 256 }
   0x8   :  { %p420_p0 = scmp.ne.s32.totalorder %s638_s1, %s419_s9  ;;  %p423_p1 = scmp.lt.u32.totalorder %s419_s9, %s638_s1 }
   0xa   :  { %p425_p2 = pnand %p423_p1, %p420_p0 }
   0xc   :  { %428 = shalt.err (!%p425_p2)
}
   0xd   :  { %s429_s13 = scalar_lea.vmem %s35_s27, 256  ;;  %p434_p4 = scmp.lt.s32.totalorder %s35_s27, %s35_s27 }
   0xe   :  { %p430_p3 = scmp.ne.s32.totalorder %s35_s27, %s429_s13  ;;  %p435_p5 = scmp.lt.s32.totalorder %s429_s13, %s429_s13 }
  0x10   :  { %p436_p6 = por %p435_p5, %p434_p4 }
  0x12   :  { %p437_p7 = pnand %p436_p6, %p430_p3 }
  0x14   :  { %440 = shalt.err (!%p437_p7)
}
  0x15   :  { %s515_s14 = smov 64   ;;  %s516_s15 = smov 4  }
  0x16   :  { %40 = dma.hbm_to_vmem [thread:$0]  %s638_s1, 256, %s35_s27, [#allocation7], %s515_s14, %s515_s14, %s516_s15  }
  0x17   :  { %s441_s20 = scalar_lea.hbm %s637_s0, 128 }
  0x18   :  { %p442_p8 = scmp.ne.s32.totalorder %s637_s0, %s441_s20  ;;  %p445_p9 = scmp.lt.u32.totalorder %s441_s20, %s637_s0 }
  0x1a   :  { %p447_p10 = pnand %p445_p9, %p442_p8 }
  0x1c   :  { %450 = shalt.err (!%p447_p10)
}
  0x1d   :  { %s451_s25 = scalar_lea.vmem %s564_s29, 128  ;;  %p456_p12 = scmp.lt.s32.totalorder %s564_s29, %s564_s29 }
  0x1e   :  { %p452_p11 = scmp.ne.s32.totalorder %s564_s29, %s451_s25  ;;  %p457_p13 = scmp.lt.s32.totalorder %s451_s25, %s451_s25 }
  0x20   :  { %p458_p0 = por %p457_p13, %p456_p12 }
  0x22   :  { %p459_p1 = pnand %p458_p0, %p452_p11 }
  0x24   :  { %462 = shalt.err (!%p459_p1)
}
  0x25   :  { %28 = dma.hbm_to_vmem [thread:$0]  %s637_s0, 128, %s564_s29, [#allocation4], %s515_s14, %s515_s14, %s516_s15  }
  0x26   :  { %s517_s27 = smov [#allocation8]   ;;  %s463_s9 = scalar_lea.hbm %s640_s3, 1024 }
  0x27   :  { %s48_s28 = sshll.u32 %s517_s27, 4  ;;  %p464_p2 = scmp.ne.s32.totalorder %s640_s3, %s463_s9  ;;  %s49_s28 = int_to_ptr.vmem [resolvable:$true] %s48_s28 }
  0x28   :  { %p467_p3 = scmp.lt.u32.totalorder %s463_s9, %s640_s3 }
  0x2a   :  { %p469_p4 = pnand %p467_p3, %p464_p2 }
  0x2c   :  { %472 = shalt.err (!%p469_p4)
}
  0x2d   :  { %s473_s13 = scalar_lea.vmem %s49_s28, 1024  ;;  %p478_p6 = scmp.lt.s32.totalorder %s49_s28, %s49_s28 }
  0x2e   :  { %p474_p5 = scmp.ne.s32.totalorder %s49_s28, %s473_s13  ;;  %p479_p7 = scmp.lt.s32.totalorder %s473_s13, %s473_s13 }
  0x30   :  { %p480_p8 = por %p479_p7, %p478_p6 }
  0x32   :  { %p481_p9 = pnand %p480_p8, %p474_p5 }
  0x34   :  { %484 = shalt.err (!%p481_p9)
}
  0x35   :  { %54 = dma.hbm_to_vmem [thread:$0]  %s640_s3, 1024, %s49_s28, [#allocation7], %s515_s14, %s515_s14, %s516_s15  }
  0x36   :  { %507 = dma.done.wait [#allocation4], 128  }
  0x37   :  { %508 = vsyncadd [#allocation4], 4294967168 }
  0x38   :  { %509 = dma.done.wait [#allocation7], 1280  }
  0x39   :  { %510 = vsyncadd [#allocation7], 4294966016  ;;  %v518_v1 = vmov 0.0   ;;  %vm519_vm0 = vmmov 0   ;;  %v404_v2 = vld [vmem:[#allocation6] sm:$0xff]   ;;  %v405_v3 = vld [vmem:[#allocation6 + $0x8] sm:$0xff]  }
  0x3a   :  { %368 = vmatprep.subr.bf16.mxu0 %v518_v1  ;;  %372 = vmatprep.mubr.msk.bf16.mxu0 %vm519_vm0, %v518_v1  ;;  %v407_v4 = vld [vmem:[#allocation8] sm:$0xff]   ;;  %v406_v5 = vld [vmem:[#allocation3] sm:$0xff]   ;;  %vm101_vm1 = vcmask 261120   ;;  %v409_v7 = vld [vmem:[#allocation8 + $0x10] sm:$0xff]   ;;  %vm322_vm2 = vcmask 122880  }
  0x3b   :  { %376 = vmatprep.subr.bf16.mxu1 %v518_v1  ;;  %392 = vmatprep.mubr.msk.bf16.mxu1 %vm519_vm0, %v518_v1  ;;  %v408_v6 = vld [vmem:[#allocation8 + $0x8] sm:$0xff]   ;;  %v410_v8 = vld [vmem:[#allocation8 + $0x18] sm:$0xff]   ;;  %v411_v9 = vld [vmem:[#allocation8 + $0x20] sm:$0xff]  }
  0x3c   :  { %369 = vmatpush3.bf16.msra.mxu0 %v404_v2  ;;  %377 = vmatpush3.bf16.msra.mxu1 %v407_v4  ;;  %v412_v10 = vld [vmem:[#allocation8 + $0x28] sm:$0xff]   ;;  %v413_v11 = vld [vmem:[#allocation8 + $0x30] sm:$0xff]   ;;  %v414_v12 = vld [vmem:[#allocation8 + $0x38] sm:$0xff]  }
  0x3d   :  { %370 = vmatprep.subr.bf16.mxu0 %v518_v1  ;;  %378 = vmatprep.subr.bf16.mxu1 %v518_v1  ;;  %v340_v13 = vld [vmem:[%s639_s2] ss:$0 sm:$0xff] }
  0x3e   :  { %v345_v23 = vld [vmem:[%s641_s4] ss:$0 sm:$0xff]  ;;  %s520_s4 = smov [#allocation9]  }
  0x3f   :  { %v354_v28 = vld [vmem:[%s642_s5] ss:$0 sm:$0xff]  ;;  %s330_s5 = sshll.u32 %s520_s4, 4  ;;  %s331_s5 = int_to_ptr.vmem [resolvable:$true] %s330_s5 }
  0x40   :  { %371 = vmatpush3.bf16.msra.mxu0 %v405_v3  ;;  %379 = vmatpush3.bf16.msra.mxu1 %v408_v6  ;;  %v355_v35 = vld [vmem:[#allocation2] ss:$0 sm:$0xff]  ;;  %s485_s18 = scalar_lea.vmem %s331_s5, 16  ;;  %s489_s19 = scalar_lea.vmem %s331_s5, 32 }
  0x41   :  { %380 = vmatprep.subr.bf16.mxu1 %v518_v1  ;;  %p486_p10 = scmp.ne.s32.totalorder %s331_s5, %s485_s18  ;;  %p490_p11 = scmp.lt.s32.totalorder %s331_s5, %s331_s5 }
  0x42   :  { %p491_p12 = scmp.lt.s32.totalorder %s489_s19, %s485_s18 }
  0x43   :  { %373 = vmatmul.mubr.msk.bf16.vlgmr.msra.gmra.mrb[0].mxu0 %vm101_vm1, %v406_v5 }
  0x44   :  { %381 = vmatpush3.bf16.msra.mxu1 %v409_v7  ;;  %p492_p13 = por %p491_p12, %p490_p11 }
  0x45   :  { %382 = vmatprep.subr.bf16.mxu1 %v518_v1 }
  0x46   :  { %p493_p0 = pnand %p492_p13, %p486_p10 }
  0x48   :  { %383 = vmatpush3.bf16.msra.mxu1 %v410_v8 }
  0x49   :  { %384 = vmatprep.subr.bf16.mxu1 %v518_v1 }
  0x4c   :  { %385 = vmatpush3.bf16.msra.mxu1 %v411_v9 }
  0x4d   :  { %386 = vmatprep.subr.bf16.mxu1 %v518_v1 }
  0x50   :  { %387 = vmatpush3.bf16.msra.mxu1 %v412_v10 }
  0x51   :  { %388 = vmatprep.subr.bf16.mxu1 %v518_v1 }
  0x54   :  { %389 = vmatpush3.bf16.msra.mxu1 %v413_v11 }
  0x55   :  { %390 = vmatprep.subr.bf16.mxu1 %v518_v1 }
  0x58   :  { %391 = vmatpush3.bf16.msra.mxu1 %v414_v12 }
 0x116   :  { %v139_v14 = vpop.f32.mrb[0].mxu0 }
 0x117   :  { %v140_v15 = vadd.f32 %v340_v13, %v139_v14  ;;  %v374_v16 = vpop.f32.mrb[1].mxu0 }
 0x118   :  { %v142_v17 = vpop.f32.mrb[2].mxu0 }
 0x119   :  { %v143_v18 = vadd.f32 %v340_v13, %v142_v17  ;;  %v375_v19 = vpop.f32.mrb[3].mxu0  ;;  %v146_v20 = vmax.f32 %v140_v15, 0.0 }
 0x11b   :  { %v147_v21 = vmax.f32 %v143_v18, 0.0 }
 0x11d   :  { %v148_v22 = vpack.c.bf16 %v147_v21, %v146_v20 }
 0x11f   :  { %393 = vmatmul.mubr.bf16.vlgmr.msra.gmra.mrb[0].mxu1 %v148_v22 }
 0x1f2   :  { %v254_v24 = vpop.f32.mrb[0].mxu1 }
 0x1f3   :  { %v255_v25 = vadd.f32 %v345_v23, %v254_v24  ;;  %v394_v26 = vpop.f32.mrb[1].mxu1 }
 0x1f4   :  { %v257_v27 = vpop.f32.mrb[2].mxu1 }
 0x1f5   :  { %v261_v29 = vmax.f32 %v255_v25, 0.0  ;;  %v258_v30 = vadd.f32 %v345_v23, %v257_v27  ;;  %v395_v31 = vpop.f32.mrb[3].mxu1 }
 0x1f7   :  { %v262_v32 = vmax.f32 %v258_v30, 0.0  ;;  %v270_v33 = vmul.f32 %v354_v28, %v261_v29 }
 0x1f9   :  { %272 = vadd.xlane.f32.xlu0 %v270_v33  ;;  %v271_v34 = vmul.f32 %v354_v28, %v262_v32 }
 0x1fd   :  { %274 = vadd.xlane.f32.xlu0 %v271_v34 }
 0x286   :  { %v273_v36 = vpop.xlane.xlu0 %272 }
 0x287   :  { %v283_v37 = vadd.f32 %v355_v35, %v273_v36 }
 0x289   :  { %285 = vxpose.xlu1.b32.start [1/2] (short) (narrow) %v283_v37, 8 }
 0x28a   :  { %v275_v38 = vpop.xlane.xlu0 %274 }
 0x28b   :  { %v284_v39 = vadd.f32 %v355_v35, %v275_v38 }
 0x28d   :  { %286 = vxpose.xlu1.b32.end [2/2] (short) (narrow) %v284_v39, 8 }
 0x309   :  { %v301_v40 = vpop.trf.xlu1 }
 0x30a   :  { %v317_v41 = vsub.f32 0.0, %v301_v40 }
 0x30c   :  { %v318_v42 = vmul.f32 1.442695, %v317_v41 }
 0x30e   :  { %415 = vpow2.f32 %v318_v42 }
 0x318   :  { %v416_v43 = vpop.eup %415 }
 0x319   :  { %v320_v44 = vadd.f32 1.0, %v416_v43 }
 0x31b   :  { %417 = vrcp.f32 %v320_v44 }
 0x325   :  { %v418_v45 = vpop.eup %417 }
 0x326   :  { %323 = vst.msk [vmem:[#allocation9] sm:$0x1] %vm322_vm2, %v418_v45 }
 0x327   :  { %496 = shalt.err (!%p493_p0)
}
 0x328   :  { %s497_s22 = scalar_lea.hbm %s644_s7, 16 }
 0x329   :  { %p498_p1 = scmp.ne.s32.totalorder %s644_s7, %s497_s22  ;;  %p501_p2 = scmp.lt.u32.totalorder %s497_s22, %s644_s7 }
 0x32b   :  { %p503_p3 = pnand %p501_p2, %p498_p1 }
 0x32d   :  { %506 = shalt.err (!%p503_p3)
}
 0x32e   :  { %333 = dma.vmem_to_hbm [thread:$0]  %s331_s5, 16, %s644_s7, [#allocation5]  }
 0x32f   :  { %511 = dma.done.wait [#allocation5], 16  }
 0x330   :  { %512 = vsyncadd [#allocation5], 4294967280 }
 0x331   :  { %337 = vsyncpa [#allocation4], 1 }
 0x332   :  { %338 = vsyncpa [#allocation7], 1 }
 0x333   :  { %339 = vsyncpa [#allocation5], 1 }

</bundles_post_ra>
